<compile_context>
chip_gen: v6e
topology: v6e:2x2x1
jax: 0.10.0
libtpu: 0.0.40
codegen_flags: <defaults>
</compile_context>

<pallas_src>
import jax
import jax.numpy as jnp
from jax.experimental import pallas as pl
from jax.experimental.pallas import tpu as pltpu

HIDDEN = 768
N_A, N_B, N_C = 2, 29, 30
N_IN = N_A + N_B + N_C          # 61 (concatenated logits width)
K_PAD = 64                      # merged width: [a|b|c|1.0|0|0]
N_OUT = 30
OUT_PAD = 128                   # lane-dense output slab width
MIN_TILE_B = 16                 # bf16 sublane packing
MAX_TILE_B = 1024               # batch tile (rows per grid step)


def _round_up(x, m):
    return ((x + m - 1) // m) * m


def _choose_tiling(B):
    """Pick (B_pad, tile_b): 16-row aligned, <=1024 rows/tile, >=2 grid steps when
    the batch is large enough (so both v7x TensorCores get work)."""
    B_pad = _round_up(max(B, MIN_TILE_B), MIN_TILE_B)
    tile_b = min(B_pad, MAX_TILE_B)
    if B_pad >= 2 * MIN_TILE_B and tile_b == B_pad:
        tile_b = _round_up((B_pad + 1) // 2, MIN_TILE_B)
    B_pad = _round_up(B_pad, tile_b)
    return B_pad, tile_b


def split_models_head_kernel(x_ref, wf_ref, w2_ref, b2_ref, out_ref):
    """x:(tb,64) bf16   wf:(64,768) bf16 (bias folded in row 61)
       w2:(768,128) bf16   b2:(1,128) f32   out:(tb,128) f32."""
    f32 = jnp.float32
    # Fused [fc1|fc2|fc3] + cls1 (+ bias via the constant-1 lane): one bf16 MXU pass,
    # f32 accumulation.
    pre = jnp.dot(x_ref[...], wf_ref[...], preferred_element_type=f32)
    # Dropout(p=0.1) -> identity at inference; Tanh in f32 (v5e EUP has no bf16).
    h = jnp.tanh(pre).astype(jnp.bfloat16)
    # cls2 on a lane-dense 128-wide output slab (cols 30: are zero weights).
    out_ref[...] = (jnp.dot(h, w2_ref[...], preferred_element_type=f32)
                    + b2_ref[...]).astype(out_ref.dtype)


def prepare_params(params):
    """One-time offline parameter prep.

    Dropout is identity at inference and there is no nonlinearity between fcN and the
    first classifier Linear, so fold them:
        Wa' = fc1_w^T @ Wc1[:768]      (2, 768)
        Wb' = fc2_w^T @ Wc1[768:1536]  (29, 768)
        Wc' = fc3_w^T @ Wc1[1536:]     (30, 768)
        b'  = fc1_b @ Wc1[:768] + fc2_b @ Wc1[768:1536] + fc3_b @ Wc1[1536:] + cls1_b
    Stack Wa'/Wb'/Wc' into one (64, 768) matrix, put b' in row 61 (the merged input
    carries a constant 1.0 there), zero-pad the rest, cast to bf16.  Pad the (768,30)
    second classifier to a lane-dense (768,128) bf16 slab.
    NOTE: this fusion is inference-only (active dropout would break it).
    """
    f32 = jnp.float32
    bf16 = jnp.bfloat16
    w1t = params["fc1_w"].astype(f32).T                    # (2, 768)
    w2t = params["fc2_w"].astype(f32).T                    # (29, 768)
    w3t = params["fc3_w"].astype(f32).T                    # (30, 768)
    wc1t = params["cls1_w"].astype(f32).T                  # (2304, 768)
    A = wc1t[:HIDDEN]
    Bm = wc1t[HIDDEN:2 * HIDDEN]
    C = wc1t[2 * HIDDEN:]

    wa = w1t @ A                                           # (2, 768)
    wb = w2t @ Bm                                          # (29, 768)
    wc = w3t @ C                                           # (30, 768)
    b_fused = (params["fc1_b"].astype(f32) @ A
               + params["fc2_b"].astype(f32) @ Bm
               + params["fc3_b"].astype(f32) @ C
               + params["cls1_b"].astype(f32))             # (768,)

    w_fused = jnp.zeros((K_PAD, HIDDEN), f32)
    w_fused = w_fused.at[:N_A].set(wa)
    w_fused = w_fused.at[N_A:N_A + N_B].set(wb)
    w_fused = w_fused.at[N_A + N_B:N_IN].set(wc)
    w_fused = w_fused.at[N_IN].set(b_fused)                # bias row, hits the 1.0 lane

    w2_pad = jnp.zeros((HIDDEN, OUT_PAD), f32)
    w2_pad = w2_pad.at[:, :N_OUT].set(params["cls2_w"].astype(f32).T)
    b2_pad = jnp.zeros((1, OUT_PAD), f32)
    b2_pad = b2_pad.at[0, :N_OUT].set(params["cls2_b"].astype(f32))

    return {"w_fused": w_fused.astype(bf16),
            "w2_pad": w2_pad.astype(bf16),
            "b2_pad": b2_pad}


def merge_logits(logits_a, logits_b, logits_c):
    """Build the (B, 64) bf16 merged input: [a(2) | b(29) | c(30) | 1.0 | 0 | 0].

    Serving callers should produce this buffer directly (e.g. fused with whatever
    writes the backbone logits) and call split_models_head_merged(), avoiding the
    per-call concat/pad glue.  This helper is the convenience path; XLA fuses the
    concat/pad/cast into a single fusion.
    """
    B = logits_a.shape[0]
    f32 = jnp.float32
    x = jnp.concatenate([logits_a.astype(f32), logits_b.astype(f32),
                         logits_c.astype(f32), jnp.ones((B, 1), f32)], axis=-1)
    x = jnp.pad(x, ((0, 0), (0, K_PAD - (N_IN + 1)))).astype(jnp.bfloat16)
    return x


def split_models_head_merged(x_merged, prepared):
    """Run the head on a pre-merged (B, 64) bf16 buffer (see merge_logits)."""
    B = x_merged.shape[0]
    B_pad, tile_b = _choose_tiling(B)
    if B_pad != B:
        x_merged = jnp.pad(x_merged, ((0, B_pad - B), (0, 0)))

    wf = prepared["w_fused"]
    w2 = prepared["w2_pad"]
    b2 = prepared["b2_pad"]

    grid = (B_pad // tile_b,)
    out = pl.pallas_call(
        split_models_head_kernel,
        out_shape=jax.ShapeDtypeStruct((B_pad, OUT_PAD), jnp.float32),
        grid_spec=pltpu.PrefetchScalarGridSpec(
            num_scalar_prefetch=0,
            grid=grid,
            in_specs=[
                # activations: tiled over batch
                pl.BlockSpec((tile_b, K_PAD), lambda i: (i, 0)),
                # weights/bias: constant index_map -> fetched once, VMEM-resident
                pl.BlockSpec((K_PAD, HIDDEN), lambda i: (0, 0)),
                pl.BlockSpec((HIDDEN, OUT_PAD), lambda i: (0, 0)),
                pl.BlockSpec((1, OUT_PAD), lambda i: (0, 0)),
            ],
            out_specs=pl.BlockSpec((tile_b, OUT_PAD), lambda i: (i, 0)),
        ),
        compiler_params=pltpu.CompilerParams(
            dimension_semantics=("parallel",)),
    )(x_merged, wf, w2, b2)

    # Padded rows / padded output lanes hold garbage by construction; always slice.
    return out[:B, :N_OUT]


def split_models_head(logits_a, logits_b, logits_c, prepared):
    """Convenience wrapper: merge the three logits blocks, then run the kernel."""
    return split_models_head_merged(merge_logits(logits_a, logits_b, logits_c),
                                    prepared)


def init_params(key):
    ks = jax.random.split(key, 10)

    def lin(kw, kb, out_f, in_f):
        bound = 1.0 / jnp.sqrt(in_f)
        w = jax.random.uniform(kw, (out_f, in_f), jnp.float32, -bound, bound)
        b = jax.random.uniform(kb, (out_f,), jnp.float32, -bound, bound)
        return w, b

    p = {}
    p["fc1_w"], p["fc1_b"] = lin(ks[0], ks[1], HIDDEN, N_A)
    p["fc2_w"], p["fc2_b"] = lin(ks[2], ks[3], HIDDEN, N_B)
    p["fc3_w"], p["fc3_b"] = lin(ks[4], ks[5], HIDDEN, N_C)
    p["cls1_w"], p["cls1_b"] = lin(ks[6], ks[7], HIDDEN, HIDDEN * 3)
    p["cls2_w"], p["cls2_b"] = lin(ks[8], ks[9], N_OUT, HIDDEN)
    return p


def reference_head(logits_a, logits_b, logits_c, p):
    ha = logits_a @ p["fc1_w"].T + p["fc1_b"]
    hb = logits_b @ p["fc2_w"].T + p["fc2_b"]
    hc = logits_c @ p["fc3_w"].T + p["fc3_b"]
    cat = jnp.concatenate([ha, hb, hc], axis=-1)
    h = jnp.tanh(cat @ p["cls1_w"].T + p["cls1_b"])
    return h @ p["cls2_w"].T + p["cls2_b"]


if __name__ == "__main__":
    key = jax.random.PRNGKey(0)
    k_param, k_a, k_b, k_c = jax.random.split(key, 4)

    B = 8  # small batch
    params = init_params(k_param)

    # One-time offline weight fusion / bf16 packing (not paid per inference call).
    prepared = jax.tree_util.tree_map(jax.block_until_ready, prepare_params(params))

    # Synthetic stand-ins for the three frozen RoBERTa heads' logits.
    logits_a = jax.random.normal(k_a, (B, N_A), jnp.float32)
    logits_b = jax.random.normal(k_b, (B, N_B), jnp.float32)
    logits_c = jax.random.normal(k_c, (B, N_C), jnp.float32)

    out = split_models_head(logits_a, logits_b, logits_c, prepared)
    out = jax.block_until_ready(out)

    ref = reference_head(logits_a, logits_b, logits_c, params)
    assert out.shape == (B, N_OUT)
    max_err = float(jnp.max(jnp.abs(out - ref)))
    # bf16 weights/activations (f32 accumulation) -> loosened tolerance vs. f32 ref.
    assert jnp.allclose(out, ref, atol=5e-2, rtol=5e-2), max_err

    print("KERNEL_OK")
</pallas_src>

<mosaic_0001>
module attributes {stable_mosaic.version = 11 : i64} {
  func.func @split_models_head_kernel(%arg0: i32, %arg1: memref<16x64xbf16, #tpu.memory_space<vmem>>, %arg2: memref<64x768xbf16, #tpu.memory_space<vmem>>, %arg3: memref<768x128xbf16, #tpu.memory_space<vmem>>, %arg4: memref<1x128xf32, #tpu.memory_space<vmem>>, %arg5: memref<16x128xf32, #tpu.memory_space<vmem>>) attributes {dimension_semantics = [#tpu.dimension_semantics<parallel>], iteration_bounds = array<i64: 1>, scalar_prefetch = 0 : i64, scratch_operands = 0 : i64, tpu.core_type = #tpu.core_type<tc>, window_params = [{transform_indices = @transform_0, window_bounds = array<i64: 16, 64>}, {pipeline_mode = #tpu.pipeline_mode<synchronous>, transform_indices = @transform_1, window_bounds = array<i64: 64, 768>}, {pipeline_mode = #tpu.pipeline_mode<synchronous>, transform_indices = @transform_2, window_bounds = array<i64: 768, 128>}, {pipeline_mode = #tpu.pipeline_mode<synchronous>, transform_indices = @transform_3, window_bounds = array<i64: 1, 128>}, {transform_indices = @transform_4, window_bounds = array<i64: 16, 128>}]} {
    %c0 = arith.constant 0 : index
    %c0_0 = arith.constant 0 : index
    %0 = vector.load %arg1[%c0, %c0_0] : memref<16x64xbf16, #tpu.memory_space<vmem>>, vector<16x64xbf16>
    %c0_1 = arith.constant 0 : index
    %c0_2 = arith.constant 0 : index
    %1 = vector.load %arg2[%c0_1, %c0_2] : memref<64x768xbf16, #tpu.memory_space<vmem>>, vector<64x768xbf16>
    %cst = arith.constant dense<0.000000e+00> : vector<16x768xf32>
    %2 = tpu.matmul %0, %1, %cst {dimension_numbers = #tpu.dot_dimension_numbers<[1], [0], [0], [1], [0, 0, 1, 1], [], []>} : vector<16x64xbf16>, vector<64x768xbf16>, vector<16x768xf32> -> vector<16x768xf32>
    %3 = math.tanh %2 : vector<16x768xf32>
    %4 = arith.truncf %3 : vector<16x768xf32> to vector<16x768xbf16>
    %c0_3 = arith.constant 0 : index
    %c0_4 = arith.constant 0 : index
    %5 = vector.load %arg3[%c0_3, %c0_4] : memref<768x128xbf16, #tpu.memory_space<vmem>>, vector<768x128xbf16>
    %cst_5 = arith.constant dense<0.000000e+00> : vector<16x128xf32>
    %6 = tpu.matmul %4, %5, %cst_5 {dimension_numbers = #tpu.dot_dimension_numbers<[1], [0], [0], [1], [0, 0, 1, 1], [], []>} : vector<16x768xbf16>, vector<768x128xbf16>, vector<16x128xf32> -> vector<16x128xf32>
    %c0_6 = arith.constant 0 : index
    %c0_7 = arith.constant 0 : index
    %7 = vector.load %arg4[%c0_6, %c0_7] : memref<1x128xf32, #tpu.memory_space<vmem>>, vector<1x128xf32>
    %8 = vector.broadcast %7 : vector<1x128xf32> to vector<16x128xf32>
    %9 = arith.addf %6, %8 : vector<16x128xf32>
    %c0_8 = arith.constant 0 : index
    %c0_9 = arith.constant 0 : index
    %10 = vector.load %arg5[%c0_8, %c0_9] : memref<16x128xf32, #tpu.memory_space<vmem>>, vector<16x128xf32>
    tpu.vector_store %arg5[%c0_8, %c0_9], %9 {strides = array<i32>} : memref<16x128xf32, #tpu.memory_space<vmem>>, vector<16x128xf32>,
    return
  }
  func.func @transform_0(%arg0: i32) -> (i32, i32) {
    %c0_i32 = arith.constant 0 : i32
    %c0_i32_0 = arith.constant 0 : i32
    return %arg0, %c0_i32 : i32, i32
  }
  func.func @transform_1(%arg0: i32) -> (i32, i32) {
    %c0_i32 = arith.constant 0 : i32
    %c0_i32_0 = arith.constant 0 : i32
    %c0_i32_1 = arith.constant 0 : i32
    return %c0_i32, %c0_i32_0 : i32, i32
  }
  func.func @transform_2(%arg0: i32) -> (i32, i32) {
    %c0_i32 = arith.constant 0 : i32
    %c0_i32_0 = arith.constant 0 : i32
    %c0_i32_1 = arith.constant 0 : i32
    return %c0_i32, %c0_i32_0 : i32, i32
  }
  func.func @transform_3(%arg0: i32) -> (i32, i32) {
    %c0_i32 = arith.constant 0 : i32
    %c0_i32_0 = arith.constant 0 : i32
    %c0_i32_1 = arith.constant 0 : i32
    return %c0_i32, %c0_i32_0 : i32, i32
  }
  func.func @transform_4(%arg0: i32) -> (i32, i32) {
    %c0_i32 = arith.constant 0 : i32
    %c0_i32_0 = arith.constant 0 : i32
    return %arg0, %c0_i32 : i32, i32
  }
}

</mosaic_0001>

<bundles_post_ra>
// kernel: tpu_custom_call.1
= control target key start
LH: loop header
LB: loop body
LE: loop exit
PB: predicated region body
PF: predicated region fallthrough
CT: control target
= control target key end

     0   :  { %9 = vsyncpa [#allocation3], 0  ;;  %s1299_s0 = inlined_call_operand.hbm [shape: bf16[16,64], index: 0, kind: input, shape index: {}]   ;;  %s1300_s1 = inlined_call_operand.hbm [shape: bf16[64,768], index: 1, kind: input, shape index: {}]   ;;  %s1301_s2 = inlined_call_operand.hbm [shape: bf16[768,128], index: 2, kind: input, shape index: {}]   ;;  %s1302_s3 = inlined_call_operand.vmem [shape: f32[1,128], index: 3, kind: input, shape index: {}]   ;;  %s1303_s4 = inlined_call_operand.hbm [shape: f32[16,128], index: 4, kind: output, shape index: {}]  }
   0x1   :  { %10 = vsyncpa [#allocation6], 0 }
   0x2   :  { %11 = vsyncpa [#allocation4], 0  ;;  %s1245_s15 = smov [#allocation5]  }
   0x3   :  { %s29_s16 = sshll.u32 %s1245_s15, 4  ;;  %s30_s16 = int_to_ptr.vmem [resolvable:$true] %s29_s16 }
   0x4   :  { %s1167_s17 = scalar_lea.vmem %s30_s16, 3072  ;;  %p1172_p1 = scmp.lt.s32.totalorder %s30_s16, %s30_s16 }
   0x5   :  { %p1168_p0 = scmp.ne.s32.totalorder %s30_s16, %s1167_s17  ;;  %p1173_p2 = scmp.lt.s32.totalorder %s1167_s17, %s1167_s17 }
   0x7   :  { %p1174_p3 = por %p1173_p2, %p1172_p1 }
   0x9   :  { %p1175_p4 = pnand %p1174_p3, %p1168_p0 }
   0xb   :  { %1178 = shalt.err (!%p1175_p4)
}
   0xc   :  { %s1246_s18 = smov 384   ;;  %s1247_s19 = smov 24  }
   0xd   :  { %35 = dma.hbm_to_vmem [thread:$0]  %s1300_s1, 3072, %s30_s16, [#allocation6], %s1246_s18, %s1246_s18, %s1247_s19  }
   0xe   :  { %s1248_s22 = smov [#allocation2]  }
   0xf   :  { %s17_s23 = sshll.u32 %s1248_s22, 4  ;;  %s18_s23 = int_to_ptr.vmem [resolvable:$true] %s17_s23 }
  0x10   :  { %s1187_s24 = scalar_lea.vmem %s18_s23, 128  ;;  %p1192_p6 = scmp.lt.s32.totalorder %s18_s23, %s18_s23 }
  0x11   :  { %p1188_p5 = scmp.ne.s32.totalorder %s18_s23, %s1187_s24  ;;  %p1193_p7 = scmp.lt.s32.totalorder %s1187_s24, %s1187_s24 }
  0x13   :  { %p1194_p8 = por %p1193_p7, %p1192_p6 }
  0x15   :  { %p1195_p9 = pnand %p1194_p8, %p1188_p5 }
  0x17   :  { %1198 = shalt.err (!%p1195_p9)
}
  0x18   :  { %s1249_s25 = smov 64   ;;  %s1250_s26 = smov 4  }
  0x19   :  { %23 = dma.hbm_to_vmem [thread:$0]  %s1299_s0, 128, %s18_s23, [#allocation3], %s1249_s25, %s1249_s25, %s1250_s26  }
  0x1a   :  { %s1251_s29 = smov [#allocation7]  }
  0x1b   :  { %s41_s30 = sshll.u32 %s1251_s29, 4  ;;  %s42_s30 = int_to_ptr.vmem [resolvable:$true] %s41_s30 }
  0x1c   :  { %s1207_s1 = scalar_lea.vmem %s42_s30, 6144  ;;  %p1212_p11 = scmp.lt.s32.totalorder %s42_s30, %s42_s30 }
  0x1d   :  { %p1208_p10 = scmp.ne.s32.totalorder %s42_s30, %s1207_s1  ;;  %p1213_p12 = scmp.lt.s32.totalorder %s1207_s1, %s1207_s1 }
  0x1f   :  { %p1214_p13 = por %p1213_p12, %p1212_p11 }
  0x21   :  { %p1215_p0 = pnand %p1214_p13, %p1208_p10 }
  0x23   :  { %1218 = shalt.err (!%p1215_p0)
}
  0x24   :  { %47 = dma.hbm_to_vmem [thread:$0]  %s1301_s2, 6144, %s42_s30, [#allocation6], %s1249_s25, %s1249_s25, %s1250_s26  }
  0x25   :  { %1239 = dma.done.wait [#allocation3], 128  }
  0x26   :  { %1240 = vsyncadd [#allocation3], 4294967168 }
  0x27   :  { %1241 = dma.done.wait [#allocation6], 9216  }
  0x28   :  { %1242 = vsyncadd [#allocation6], 4294958080  ;;  %v1252_v0 = vmov 0   ;;  %v1050_v1 = vld [vmem:[#allocation5 + $0x94] ss:$24 sps:$4 sm:$0xff]   ;;  %v1074_v18 = vld [vmem:[#allocation2] sm:$0xff]  }
  0x29   :  { %247 = vmatprep.mubr.bf16.mxu0 %v1252_v0  ;;  %290 = vmatprep.mubr.bf16.mxu1 %v1252_v0  ;;  %v1052_v2 = vld [vmem:[#allocation5 + $0x90] ss:$24 sps:$4 sm:$0xff]   ;;  %v1053_v3 = vld [vmem:[#allocation5 + $0x9c] ss:$24 sps:$4 sm:$0xff]   ;;  %v1058_v6 = vld [vmem:[#allocation5 + $0x60] ss:$24 sps:$4 sm:$0xff]  }
  0x2a   :  { %223 = vmatprep.subr.bf16.mxu0 %v1050_v1  ;;  %v1055_v4 = vld [vmem:[#allocation5 + $0x98] ss:$24 sps:$4 sm:$0xff]   ;;  %v1056_v5 = vld [vmem:[#allocation5 + $0x64] ss:$24 sps:$4 sm:$0xff]   ;;  %266 = vmatprep.subr.bf16.mxu1 %v1053_v3  ;;  %v1061_v8 = vld [vmem:[#allocation5 + $0x68] ss:$24 sps:$4 sm:$0xff]  }
  0x2b   :  { %224 = vmatpush1.bf16.msra.mxu0 %v1052_v2  ;;  %v1059_v7 = vld [vmem:[#allocation5 + $0x6c] ss:$24 sps:$4 sm:$0xff]   ;;  %267 = vmatpush1.bf16.msra.mxu1 %v1055_v4  ;;  %v1064_v10 = vld [vmem:[#allocation5 + $0x30] ss:$24 sps:$4 sm:$0xff]   ;;  %v1065_v11 = vld [vmem:[#allocation5 + $0x3c] ss:$24 sps:$4 sm:$0xff]  }
  0x2c   :  { %225 = vmatprep.subr.bf16.mxu0 %v1056_v5  ;;  %268 = vmatprep.subr.bf16.mxu1 %v1059_v7  ;;  %v1062_v9 = vld [vmem:[#allocation5 + $0x34] ss:$24 sps:$4 sm:$0xff]   ;;  %v1068_v12 = vld [vmem:[#allocation5 + $0x4] ss:$24 sps:$4 sm:$0xff]   ;;  %v1067_v13 = vld [vmem:[#allocation5 + $0x38] ss:$24 sps:$4 sm:$0xff]  }
  0x2d   :  { %v1071_v14 = vld [vmem:[#allocation5 + $0xc] ss:$24 sps:$4 sm:$0xff]   ;;  %v1070_v15 = vld [vmem:[#allocation5] ss:$24 sps:$4 sm:$0xff]   ;;  %vm211_vm0 = vcmask 523264   ;;  %v1090_v25 = vld [vmem:[#allocation7 + $0x70] sm:$0xff]  }
  0x2e   :  { %v1077_v16 = vld [vmem:[#allocation5 + $0xa4] ss:$24 sps:$4 sm:$0xff]   ;;  %v1073_v17 = vld [vmem:[#allocation5 + $0x8] ss:$24 sps:$4 sm:$0xff]   ;;  %v1080_v20 = vld [vmem:[#allocation5 + $0x74] ss:$24 sps:$4 sm:$0xff]  }
  0x2f   :  { %226 = vmatpush1.bf16.msra.mxu0 %v1058_v6  ;;  %269 = vmatpush1.bf16.msra.mxu1 %v1061_v8  ;;  %v1075_v19 = vld [vmem:[#allocation5 + $0xa0] ss:$24 sps:$4 sm:$0xff]   ;;  %v1078_v21 = vld [vmem:[#allocation5 + $0x70] ss:$24 sps:$4 sm:$0xff]   ;;  %v1083_v24 = vld [vmem:[#allocation5 + $0x44] ss:$24 sps:$4 sm:$0xff]  }
  0x30   :  { %227 = vmatprep.subr.bf16.mxu0 %v1062_v9  ;;  %270 = vmatprep.subr.bf16.mxu1 %v1065_v11  ;;  %v1087_v22 = vld [vmem:[#allocation7 + $0x78] sm:$0xff]   ;;  %v1092_v27 = vld [vmem:[#allocation7 + $0x30] sm:$0xff]   ;;  %v1094_v29 = vld [vmem:[#allocation7 + $0x68] sm:$0xff]   ;;  %s1253_s7 = smov [#allocation8]  }
  0x31   :  { %v1088_v23 = vld [vmem:[#allocation7 + $0x38] sm:$0xff]   ;;  %v1086_v28 = vld [vmem:[#allocation5 + $0x14] ss:$24 sps:$4 sm:$0xff]   ;;  %v1084_v30 = vld [vmem:[#allocation5 + $0x10] ss:$24 sps:$4 sm:$0xff]   ;;  %s883_s8 = sshll.u32 %s1253_s7, 4  ;;  %s884_s8 = int_to_ptr.vmem [resolvable:$true] %s883_s8 }
  0x32   :  { %v1081_v26 = vld [vmem:[#allocation5 + $0x40] ss:$24 sps:$4 sm:$0xff]   ;;  %v1093_v33 = vld [vmem:[#allocation7 + $0xf0] sm:$0xff]   ;;  %v1096_v35 = vld [vmem:[#allocation7 + $0x28] sm:$0xff]   ;;  %p1224_p2 = scmp.lt.s32.totalorder %s884_s8, %s884_s8 }
  0x33   :  { %228 = vmatpush1.bf16.msra.mxu0 %v1064_v10  ;;  %271 = vmatpush1.bf16.msra.mxu1 %v1067_v13  ;;  %v1089_v31 = vld [vmem:[#allocation7 + $0xf8] sm:$0xff]   ;;  %v1095_v34 = vld [vmem:[#allocation7 + $0xb0] sm:$0xff]   ;;  %v1097_v36 = vld [vmem:[#allocation7 + $0xe8] sm:$0xff]  }
  0x34   :  { %229 = vmatprep.subr.bf16.mxu0 %v1068_v12  ;;  %272 = vmatprep.subr.bf16.mxu1 %v1071_v14  ;;  %v1091_v32 = vld [vmem:[#allocation7 + $0xb8] sm:$0xff]   ;;  %v1098_v37 = vld [vmem:[#allocation7 + $0x60] sm:$0xff]   ;;  %v1099_v38 = vld [vmem:[#allocation7 + $0xa8] sm:$0xff]  }
  0x35   :  { %v1100_v39 = vld [vmem:[#allocation7 + $0x20] sm:$0xff]   ;;  %v1102_v41 = vld [vmem:[#allocation7 + $0x58] sm:$0xff]   ;;  %v1106_v45 = vld [vmem:[#allocation7 + $0x50] sm:$0xff]  }
  0x36   :  { %v1101_v40 = vld [vmem:[#allocation7 + $0xe0] sm:$0xff]   ;;  %v1104_v43 = vld [vmem:[#allocation7 + $0x18] sm:$0xff]   ;;  %v1108_v47 = vld [vmem:[#allocation7 + $0x10] sm:$0xff]  }
  0x37   :  { %230 = vmatpush1.bf16.msra.mxu0 %v1070_v15  ;;  %273 = vmatpush1.bf16.msra.mxu1 %v1073_v17  ;;  %v1103_v42 = vld [vmem:[#allocation7 + $0xa0] sm:$0xff]   ;;  %v1105_v44 = vld [vmem:[#allocation7 + $0xd8] sm:$0xff]   ;;  %v1109_v48 = vld [vmem:[#allocation7 + $0xd0] sm:$0xff]  }
  0x38   :  { %309 = vmatprep.subr.bf16.mxu0 %v1077_v16  ;;  %973 = vmatprep.subr.bf16.mxu1 %v1087_v22  ;;  %v1107_v46 = vld [vmem:[#allocation7 + $0x98] sm:$0xff]   ;;  %v1110_v49 = vld [vmem:[#allocation7 + $0x48] sm:$0xff]   ;;  %v1111_v50 = vld [vmem:[#allocation7 + $0x90] sm:$0xff]  }
  0x39   :  { %v1112_v51 = vld [vmem:[#allocation7 + $0x8] sm:$0xff]   ;;  %v1114_v53 = vld [vmem:[#allocation7 + $0x40] sm:$0xff]   ;;  %v1119_v58 = vld [vmem:[#allocation7 + $0x178] sm:$0xff]  }
  0x3a   :  { %921 = vmatmul.mubr.msk.bf16.vlgmr.msra.gmra.mxu0 %vm211_vm0, %v1074_v18  ;;  %922 = vmatmul.mubr.msk.bf16.vlgmr.msra.gmra.mxu1 %vm211_vm0, %v1074_v18  ;;  %v1113_v52 = vld [vmem:[#allocation7 + $0xc8] sm:$0xff]   ;;  %v1116_v55 = vld [vmem:[#allocation7] sm:$0xff]   ;;  %v1120_v14 = vld [vmem:[#allocation7 + $0x138] sm:$0xff]  }
  0x3b   :  { %310 = vmatpush1.bf16.msra.mxu0 %v1075_v19  ;;  %333 = vmatprep.mubr.bf16.mxu0 %v1252_v0  ;;  %v1115_v54 = vld [vmem:[#allocation7 + $0x88] sm:$0xff]   ;;  %v1117_v56 = vld [vmem:[#allocation7 + $0xc0] sm:$0xff]  }
  0x3c   :  { %311 = vmatprep.subr.bf16.mxu0 %v1080_v20  ;;  %974 = vmatpush3.bf16.msra.mxu1 %v1088_v23  ;;  %v1118_v57 = vld [vmem:[#allocation7 + $0x80] sm:$0xff]   ;;  %v1123_v22 = vld [vmem:[#allocation7 + $0x168] sm:$0xff]  }
  0x3d   :  { %975 = vmatprep.subr.bf16.mxu1 %v1090_v25  ;;  %v1124_v23 = vld [vmem:[#allocation7 + $0x128] sm:$0xff]   ;;  %v1126_v25 = vld [vmem:[#allocation7 + $0x120] sm:$0xff]  }
  0x3f   :  { %312 = vmatpush1.bf16.msra.mxu0 %v1078_v21  ;;  %v1122_v21 = vld [vmem:[#allocation7 + $0x130] sm:$0xff]  }
  0x40   :  { %313 = vmatprep.subr.bf16.mxu0 %v1083_v24  ;;  %976 = vmatpush3.bf16.msra.mxu1 %v1092_v27  ;;  %v1125_v24 = vld [vmem:[#allocation7 + $0x160] sm:$0xff]   ;;  %v1127_v27 = vld [vmem:[#allocation7 + $0x158] sm:$0xff]  }
  0x41   :  { %977 = vmatprep.subr.bf16.mxu1 %v1094_v29  ;;  %v1128_v29 = vld [vmem:[#allocation7 + $0x118] sm:$0xff]  }
  0x43   :  { %314 = vmatpush1.bf16.msra.mxu0 %v1081_v26 }
  0x44   :  { %315 = vmatprep.subr.bf16.mxu0 %v1086_v28  ;;  %978 = vmatpush3.bf16.msra.mxu1 %v1096_v35  ;;  %v1133_v35 = vld [vmem:[#allocation7 + $0x140] sm:$0xff]  }
  0x45   :  { %979 = vmatprep.subr.bf16.mxu1 %v1098_v37 }
  0x47   :  { %316 = vmatpush1.bf16.msra.mxu0 %v1084_v30 }
  0x48   :  { %995 = vmatprep.subr.bf16.mxu0 %v1089_v31  ;;  %980 = vmatpush3.bf16.msra.mxu1 %v1100_v39  ;;  %v1129_v31 = vld [vmem:[#allocation7 + $0x150] sm:$0xff]  }
  0x49   :  { %981 = vmatprep.subr.bf16.mxu1 %v1102_v41 }
  0x4a   :  { %923 = vmatmul.mubr.msk.bf16.vlgmr.msra.gmra.mxu0 %vm211_vm0, %v1074_v18  ;;  %v1121_v18 = vld [vmem:[#allocation7 + $0x170] sm:$0xff]  }
  0x4b   :  { %996 = vmatpush3.bf16.msra.mxu0 %v1091_v32  ;;  %v1130_v32 = vld [vmem:[#allocation7 + $0x110] sm:$0xff]  }
  0x4c   :  { %997 = vmatprep.subr.bf16.mxu0 %v1093_v33  ;;  %982 = vmatpush3.bf16.msra.mxu1 %v1104_v43  ;;  %v1131_v33 = vld [vmem:[#allocation7 + $0x148] sm:$0xff]  }
  0x4d   :  { %983 = vmatprep.subr.bf16.mxu1 %v1106_v45 }
  0x4f   :  { %998 = vmatpush3.bf16.msra.mxu0 %v1095_v34  ;;  %v1132_v34 = vld [vmem:[#allocation7 + $0x108] sm:$0xff]  }
  0x50   :  { %999 = vmatprep.subr.bf16.mxu0 %v1097_v36  ;;  %984 = vmatpush3.bf16.msra.mxu1 %v1108_v47  ;;  %v1134_v36 = vld [vmem:[#allocation7 + $0x100] sm:$0xff]  }
  0x51   :  { %985 = vmatprep.subr.bf16.mxu1 %v1110_v49 }
  0x53   :  { %1000 = vmatpush3.bf16.msra.mxu0 %v1099_v38 }
  0x54   :  { %1001 = vmatprep.subr.bf16.mxu0 %v1101_v40  ;;  %986 = vmatpush3.bf16.msra.mxu1 %v1112_v51 }
  0x55   :  { %987 = vmatprep.subr.bf16.mxu1 %v1114_v53 }
  0x57   :  { %1002 = vmatpush3.bf16.msra.mxu0 %v1103_v42 }
  0x58   :  { %1003 = vmatprep.subr.bf16.mxu0 %v1105_v44  ;;  %988 = vmatpush3.bf16.msra.mxu1 %v1116_v55 }
  0x59   :  { %1017 = vmatprep.subr.bf16.mxu1 %v1119_v58 }
  0x5b   :  { %1004 = vmatpush3.bf16.msra.mxu0 %v1107_v46  ;;  %v924_v46 = vld [vmem:[%s1302_s3] ss:$0 sm:$0xff]  ;;  %s1219_s3 = scalar_lea.vmem %s884_s8, 256 }
  0x5c   :  { %1005 = vmatprep.subr.bf16.mxu0 %v1109_v48  ;;  %p1220_p1 = scmp.ne.s32.totalorder %s884_s8, %s1219_s3  ;;  %p1225_p3 = scmp.lt.s32.totalorder %s1219_s3, %s1219_s3 }
  0x5e   :  { %p1226_p4 = por %p1225_p3, %p1224_p2 }
  0x5f   :  { %1006 = vmatpush3.bf16.msra.mxu0 %v1111_v50 }
  0x60   :  { %1007 = vmatprep.subr.bf16.mxu0 %v1113_v52  ;;  %p1227_p5 = pnand %p1226_p4, %p1220_p1 }
  0x63   :  { %1008 = vmatpush3.bf16.msra.mxu0 %v1115_v54 }
  0x64   :  { %1009 = vmatprep.subr.bf16.mxu0 %v1117_v56 }
  0x67   :  { %1010 = vmatpush3.bf16.msra.mxu0 %v1118_v57 }
  0xfa   :  { %v249_v59 = vpop.f32.mrf.mxu0  ;;  %v292_v61 = vpop.f32.mrf.mxu1 }
  0xfb   :  { %1135 = vtanh.f32 %v249_v59 }
  0xfc   :  { %v251_v60 = vpop.f32.mrf.mxu0  ;;  %v294_v63 = vpop.f32.mrf.mxu1 }
  0xfd   :  { %1137 = vtanh.f32 %v251_v60 }
  0xfe   :  { %1139 = vtanh.f32 %v292_v61  ;;  %v253_v62 = vpop.f32.mrf.mxu0  ;;  %v296_v1 = vpop.f32.mrf.mxu1 }
  0xff   :  { %1141 = vtanh.f32 %v253_v62 }
 0x100   :  { %1143 = vtanh.f32 %v294_v63  ;;  %v255_v0 = vpop.f32.mrf.mxu0  ;;  %v298_v2 = vpop.f32.mrf.mxu1 }
 0x101   :  { %1145 = vtanh.f32 %v255_v0 }
 0x102   :  { %1147 = vtanh.f32 %v296_v1 }
 0x103   :  { %1149 = vtanh.f32 %v298_v2 }
 0x108   :  { %v1136_v3 = vpop.eup %1135 }
 0x10a   :  { %v1138_v4 = vpop.eup %1137  ;;  %v335_v5 = vpop.f32.mrf.mxu0 }
 0x10b   :  { %v1140_v6 = vpop.eup %1139 }
 0x10c   :  { %v1142_v7 = vpop.eup %1141  ;;  %v337_v8 = vpop.f32.mrf.mxu0 }
 0x10d   :  { %v1144_v9 = vpop.eup %1143  ;;  %1151 = vtanh.f32 %v337_v8  ;;  %v356_v16 = vpack.c.bf16 %v1142_v7, %v1136_v3 }
 0x10e   :  { %v1146_v10 = vpop.eup %1145  ;;  %v339_v11 = vpop.f32.mrf.mxu0 }
 0x10f   :  { %v1148_v12 = vpop.eup %1147  ;;  %v357_v13 = vpack.c.bf16 %v1146_v10, %v1138_v4 }
 0x110   :  { %v1150_v15 = vpop.eup %1149  ;;  %v358_v17 = vpack.c.bf16 %v1148_v12, %v1140_v6  ;;  %v341_v19 = vpop.f32.mrf.mxu0 }
 0x111   :  { %785 = vmatprep.mubr.bf16.mxu1 %v357_v13  ;;  %v359_v20 = vpack.c.bf16 %v1150_v15, %v1144_v9  ;;  %1153 = vtanh.f32 %v341_v19 }
 0x112   :  { %786 = vmatmul.mubr.bf16.vlgmr.msra.gmra.mxu1 %v356_v16  ;;  %1155 = vtanh.f32 %v335_v5 }
 0x113   :  { %1018 = vmatpush3.bf16.msra.mxu1 %v1120_v14  ;;  %826 = vmatprep.mubr.bf16.mxu0 %v359_v20  ;;  %1157 = vtanh.f32 %v339_v11 }
 0x114   :  { %827 = vmatmul.mubr.bf16.vlgmr.msra.gmra.mxu0 %v358_v17  ;;  %1019 = vmatprep.subr.bf16.mxu1 %v1121_v18 }
 0x117   :  { %1020 = vmatpush3.bf16.msra.mxu1 %v1122_v21 }
 0x118   :  { %1021 = vmatprep.subr.bf16.mxu1 %v1123_v22 }
 0x11a   :  { %v1152_v26 = vpop.eup %1151 }
 0x11b   :  { %1022 = vmatpush3.bf16.msra.mxu1 %v1124_v23 }
 0x11c   :  { %1023 = vmatprep.subr.bf16.mxu1 %v1125_v24 }
 0x11e   :  { %v1154_v28 = vpop.eup %1153 }
 0x11f   :  { %1024 = vmatpush3.bf16.msra.mxu1 %v1126_v25  ;;  %v361_v30 = vpack.c.bf16 %v1154_v28, %v1152_v26  ;;  %v1156_v37 = vpop.eup %1155 }
 0x120   :  { %1025 = vmatprep.subr.bf16.mxu1 %v1127_v27  ;;  %v1158_v38 = vpop.eup %1157 }
 0x121   :  { %867 = vmatprep.mubr.bf16.mxu1 %v361_v30  ;;  %v360_v39 = vpack.c.bf16 %v1158_v38, %v1156_v37 }
 0x123   :  { %1026 = vmatpush3.bf16.msra.mxu1 %v1128_v29 }
 0x124   :  { %1027 = vmatprep.subr.bf16.mxu1 %v1129_v31 }
 0x127   :  { %1028 = vmatpush3.bf16.msra.mxu1 %v1130_v32 }
 0x128   :  { %1029 = vmatprep.subr.bf16.mxu1 %v1131_v33 }
 0x12b   :  { %1030 = vmatpush3.bf16.msra.mxu1 %v1132_v34 }
 0x12c   :  { %1031 = vmatprep.subr.bf16.mxu1 %v1133_v35 }
 0x12f   :  { %1032 = vmatpush3.bf16.msra.mxu1 %v1134_v36 }
 0x132   :  { %868 = vmatmul.mubr.bf16.vlgmr.msra.gmra.mxu1 %v360_v39 }
 0x1d2   :  { %v989_v40 = vpop.f32.mrf.mxu1 }
 0x1d4   :  { %v990_v41 = vpop.f32.mrf.mxu1  ;;  %v1011_v42 = vpop.f32.mrf.mxu0 }
 0x1d5   :  { %v991_v45 = vadd.f32 %v990_v41, %v989_v40 }
 0x1d6   :  { %v992_v43 = vpop.f32.mrf.mxu1  ;;  %v1012_v44 = vpop.f32.mrf.mxu0 }
 0x1d7   :  { %v788_v49 = vadd.f32 %v991_v45, %v924_v46  ;;  %v1013_v50 = vadd.f32 %v1012_v44, %v1011_v42 }
 0x1d8   :  { %v993_v47 = vpop.f32.mrf.mxu1  ;;  %v1014_v48 = vpop.f32.mrf.mxu0 }
 0x1d9   :  { %v994_v51 = vadd.f32 %v993_v47, %v992_v43  ;;  %v829_v55 = vadd.f32 %v1013_v50, %v788_v49 }
 0x1da   :  { %v1015_v52 = vpop.f32.mrf.mxu0 }
 0x1db   :  { %v791_v56 = vadd.f32 %v994_v51, %v924_v46  ;;  %v1016_v57 = vadd.f32 %v1015_v52, %v1014_v48 }
 0x1dd   :  { %v832_v62 = vadd.f32 %v1016_v57, %v791_v56 }
 0x1f2   :  { %v1033_v53 = vpop.f32.mrf.mxu1 }
 0x1f4   :  { %v1034_v54 = vpop.f32.mrf.mxu1 }
 0x1f5   :  { %v1035_v58 = vadd.f32 %v1034_v54, %v1033_v53 }
 0x1f6   :  { %v1036_v59 = vpop.f32.mrf.mxu1 }
 0x1f7   :  { %v870_v60 = vadd.f32 %v1035_v58, %v829_v55 }
 0x1f8   :  { %v1037_v61 = vpop.f32.mrf.mxu1 }
 0x1f9   :  { %876 = vst [vmem:[#allocation8] sm:$0xff] %v870_v60  ;;  %v1038_v63 = vadd.f32 %v1037_v61, %v1036_v59 }
 0x1fb   :  { %v873_v0 = vadd.f32 %v1038_v63, %v832_v62 }
 0x1fd   :  { %877 = vst [vmem:[#allocation8 + $0x8] sm:$0xff] %v873_v0 }
 0x1fe   :  { %1230 = shalt.err (!%p1227_p5)
}
 0x1ff   :  { %s1254_s9 = smov 128   ;;  %s1255_s10 = smov 8  }
 0x200   :  { %889 = dma.vmem_to_hbm [thread:$0]  %s884_s8, 256, %s1303_s4, [#allocation4], %s1254_s9, %s1254_s9, %s1255_s10  }
 0x201   :  { %1243 = dma.done.wait [#allocation4], 256  }
 0x202   :  { %1244 = vsyncadd [#allocation4], 4294967040 }
 0x203   :  { %893 = vsyncpa [#allocation3], 1 }
 0x204   :  { %894 = vsyncpa [#allocation6], 1 }
 0x205   :  { %895 = vsyncpa [#allocation4], 1 }

</bundles_post_ra>
